<compile_context>
chip_gen: v7x
topology: tpu7x:2x2x1
jax: 0.10.0
libtpu: 0.0.40
codegen_flags: <defaults>
</compile_context>

<pallas_src>
import jax
import jax.numpy as jnp
from jax.experimental import pallas as pl
from jax.experimental.pallas import tpu as pltpu


def mlp_kernel(xT_ref, w1_ref, b1_ref, w2T_ref, b2_ref, oT_ref):
    # Upcast to f32 (no-op for f32 inputs; bf16 inputs accumulate in f32).
    xT = xT_ref[...].astype(jnp.float32)     # (F, bb)   batch on lanes
    w1 = w1_ref[...].astype(jnp.float32)     # (H, F)    PyTorch hidden.weight layout
    b1 = b1_ref[...]                         # (H, 1)    f32

    # ---- Layer 1: F broadcast outer-product FMAs on the VPU -> hT (H, bb) ----
    acc = w1[:, 0:1] * xT[0:1, :]
    for f in range(1, w1.shape[1]):          # static unroll over num_feature (=2)
        acc = acc + w1[:, f:f + 1] * xT[f:f + 1, :]
    hT = jnp.maximum(acc + b1, 0.0)          # (H, bb) f32, lane-dense ReLU

    # ---- Layer 2: per-logit sublane reduction, full-lane row store per logit ----
    w2T = w2T_ref[...].astype(jnp.float32)   # (H, O)
    b2 = b2_ref[...]                         # (O, 1)    f32
    for j in range(oT_ref.shape[0]):         # static unroll over num_output (=2)
        row = jnp.sum(w2T[:, j:j + 1] * hT, axis=0, keepdims=True) + b2[j:j + 1, :]
        oT_ref[j:j + 1, :] = row.astype(oT_ref.dtype)   # (1, bb) lane-dense row


def net_forward(x, w1, b1, w2, b2, *, param_dtype=jnp.float32, block_cap=4096):
    """MLP forward: relu(x @ w1.T + b1) @ w2.T + b2 (PyTorch parameter layouts).

    x  : (batch, num_feature)          f32
    w1 : (num_hidden, num_feature)     hidden.weight
    b1 : (num_hidden,)                 hidden.bias
    w2 : (num_output, num_hidden)      predict.weight
    b2 : (num_output,)                 predict.bias
    """
    batch, num_feature = x.shape
    num_hidden = w1.shape[0]
    num_output = w2.shape[0]

    # Kernel-side layouts: batch on lanes everywhere; biases as column vectors.
    xT = x.T.astype(param_dtype)                             # (F, batch)
    w1k = w1.astype(param_dtype)                              # (H, F)
    b1k = b1.reshape(num_hidden, 1).astype(jnp.float32)       # (H, 1)
    w2T = w2.T.astype(param_dtype)                            # (H, O)
    b2k = b2.reshape(num_output, 1).astype(jnp.float32)       # (O, 1)

    # Batch tiling: lane-dense 128-multiple blocks with cdiv + zero padding.
    # Large batches get >= 2 grid steps so the "parallel" axis shards across
    # v7x's two TensorCores; tiny batches use a single full-width block.
    LANE = 128
    if batch <= 2 * LANE:
        block_b, padded = batch, batch
    else:
        padded0 = LANE * pl.cdiv(batch, LANE)
        block_b = min(block_cap, LANE * pl.cdiv(pl.cdiv(padded0, 2), LANE))
        padded = block_b * pl.cdiv(padded0, block_b)
    if padded != batch:
        xT = jnp.pad(xT, ((0, 0), (0, padded - batch)))
    grid = (padded // block_b,)

    outT = pl.pallas_call(
        mlp_kernel,
        out_shape=jax.ShapeDtypeStruct((num_output, padded), jnp.float32),
        grid=grid,
        in_specs=[
            pl.BlockSpec((num_feature, block_b), lambda i: (0, i)),      # x^T : tiled over batch lanes
            pl.BlockSpec((num_hidden, num_feature), lambda i: (0, 0)),   # w1  : resident
            pl.BlockSpec((num_hidden, 1), lambda i: (0, 0)),             # b1  : resident
            pl.BlockSpec((num_hidden, num_output), lambda i: (0, 0)),    # w2^T: resident
            pl.BlockSpec((num_output, 1), lambda i: (0, 0)),             # b2  : resident
        ],
        out_specs=pl.BlockSpec((num_output, block_b), lambda i: (0, i)),
        compiler_params=pltpu.CompilerParams(
            dimension_semantics=("parallel",),
            vmem_limit_bytes=32 * 1024 * 1024,
        ),
    )(xT, w1k, b1k, w2T, b2k)

    return outT[:, :batch].T            # (batch, num_output)


def init_params(key, num_feature, num_hidden, num_output):
    """Deterministic init mimicking torch.nn.Linear (U(-1/sqrt(fan_in), +1/sqrt(fan_in)))."""
    k1, k2, k3, k4 = jax.random.split(key, 4)
    lim1 = 1.0 / (num_feature ** 0.5)
    lim2 = 1.0 / (num_hidden ** 0.5)
    w1 = jax.random.uniform(k1, (num_hidden, num_feature), jnp.float32, -lim1, lim1)
    b1 = jax.random.uniform(k2, (num_hidden,), jnp.float32, -lim1, lim1)
    w2 = jax.random.uniform(k3, (num_output, num_hidden), jnp.float32, -lim2, lim2)
    b2 = jax.random.uniform(k4, (num_output,), jnp.float32, -lim2, lim2)
    return w1, b1, w2, b2


if __name__ == "__main__":
    # Small shapes consistent with the module: 2 input features (two Gaussian
    # blobs at +/-2), a hidden layer, 2 output logits.
    num_feature, num_hidden, num_output = 2, 32, 2
    n_per_class = 8

    key = jax.random.PRNGKey(0)
    k_data0, k_data1, k_params, k_big = jax.random.split(key, 4)

    # Mimic the script's data: x0 ~ N(+2, 1), x1 ~ N(-2, 1), concatenated.
    x0 = 2.0 + jax.random.normal(k_data0, (n_per_class, num_feature), jnp.float32)
    x1 = -2.0 + jax.random.normal(k_data1, (n_per_class, num_feature), jnp.float32)
    x = jnp.concatenate([x0, x1], axis=0)               # (16, 2) float32

    w1, b1, w2, b2 = init_params(k_params, num_feature, num_hidden, num_output)

    def ref_fn(xx):  # PyTorch math: relu(x W1^T + b1) W2^T + b2
        return jnp.maximum(xx @ w1.T + b1, 0.0) @ w2.T + b2

    out = net_forward(x, w1, b1, w2, b2)
    jax.block_until_ready(out)
    assert out.shape == (2 * n_per_class, num_output)
    assert jnp.allclose(out, ref_fn(x), atol=1e-5, rtol=1e-5)

    # Also exercise the multi-block / padded-batch path (cdiv tiling, grid >= 2).
    x_big = jax.random.normal(k_big, (300, num_feature), jnp.float32)
    out_big = net_forward(x_big, w1, b1, w2, b2)
    jax.block_until_ready(out_big)
    assert out_big.shape == (300, num_output)
    assert jnp.allclose(out_big, ref_fn(x_big), atol=1e-4, rtol=1e-4)

    print("KERNEL_OK")
</pallas_src>

<mosaic_0001>
module attributes {stable_mosaic.version = 11 : i64} {
  func.func @mlp_kernel(%arg0: i32, %arg1: memref<2x16xf32, #tpu.memory_space<vmem>>, %arg2: memref<32x2xf32, #tpu.memory_space<vmem>>, %arg3: memref<32x1xf32, #tpu.memory_space<vmem>>, %arg4: memref<32x2xf32, #tpu.memory_space<vmem>>, %arg5: memref<2x1xf32, #tpu.memory_space<vmem>>, %arg6: memref<2x16xf32, #tpu.memory_space<vmem>>) attributes {dimension_semantics = [#tpu.dimension_semantics<parallel>], iteration_bounds = array<i64: 1>, scalar_prefetch = 0 : i64, scratch_operands = 0 : i64, tpu.core_type = #tpu.core_type<tc>, window_params = [{transform_indices = @transform_0, window_bounds = array<i64: 2, 16>}, {pipeline_mode = #tpu.pipeline_mode<synchronous>, transform_indices = @transform_1, window_bounds = array<i64: 32, 2>}, {pipeline_mode = #tpu.pipeline_mode<synchronous>, transform_indices = @transform_2, window_bounds = array<i64: 32, 1>}, {pipeline_mode = #tpu.pipeline_mode<synchronous>, transform_indices = @transform_3, window_bounds = array<i64: 32, 2>}, {pipeline_mode = #tpu.pipeline_mode<synchronous>, transform_indices = @transform_4, window_bounds = array<i64: 2, 1>}, {transform_indices = @transform_5, window_bounds = array<i64: 2, 16>}]} {
    %c0 = arith.constant 0 : index
    %c0_0 = arith.constant 0 : index
    %0 = vector.load %arg1[%c0, %c0_0] : memref<2x16xf32, #tpu.memory_space<vmem>>, vector<2x16xf32>
    %c0_1 = arith.constant 0 : index
    %c0_2 = arith.constant 0 : index
    %1 = vector.load %arg2[%c0_1, %c0_2] : memref<32x2xf32, #tpu.memory_space<vmem>>, vector<32x2xf32>
    %c0_3 = arith.constant 0 : index
    %c0_4 = arith.constant 0 : index
    %2 = vector.load %arg3[%c0_3, %c0_4] : memref<32x1xf32, #tpu.memory_space<vmem>>, vector<32x1xf32>
    %3 = vector.extract_strided_slice %1 {offsets = [0, 0], sizes = [32, 1], strides = [1, 1]} : vector<32x2xf32> to vector<32x1xf32>
    %4 = vector.extract_strided_slice %0 {offsets = [0, 0], sizes = [1, 16], strides = [1, 1]} : vector<2x16xf32> to vector<1x16xf32>
    %5 = vector.broadcast %3 : vector<32x1xf32> to vector<32x16xf32>
    %6 = vector.broadcast %4 : vector<1x16xf32> to vector<32x16xf32>
    %7 = arith.mulf %5, %6 : vector<32x16xf32>
    %8 = vector.extract_strided_slice %1 {offsets = [0, 1], sizes = [32, 1], strides = [1, 1]} : vector<32x2xf32> to vector<32x1xf32>
    %9 = vector.extract_strided_slice %0 {offsets = [1, 0], sizes = [1, 16], strides = [1, 1]} : vector<2x16xf32> to vector<1x16xf32>
    %10 = vector.broadcast %8 : vector<32x1xf32> to vector<32x16xf32>
    %11 = vector.broadcast %9 : vector<1x16xf32> to vector<32x16xf32>
    %12 = arith.mulf %10, %11 : vector<32x16xf32>
    %13 = arith.addf %7, %12 : vector<32x16xf32>
    %14 = vector.broadcast %2 : vector<32x1xf32> to vector<32x16xf32>
    %15 = arith.addf %13, %14 : vector<32x16xf32>
    %cst = arith.constant 0.000000e+00 : f32
    %16 = vector.broadcast %cst : f32 to vector<32x16xf32>
    %17 = arith.maximumf %15, %16 : vector<32x16xf32>
    %c0_5 = arith.constant 0 : index
    %c0_6 = arith.constant 0 : index
    %18 = vector.load %arg4[%c0_5, %c0_6] : memref<32x2xf32, #tpu.memory_space<vmem>>, vector<32x2xf32>
    %c0_7 = arith.constant 0 : index
    %c0_8 = arith.constant 0 : index
    %19 = vector.load %arg5[%c0_7, %c0_8] : memref<2x1xf32, #tpu.memory_space<vmem>>, vector<2x1xf32>
    %20 = vector.extract_strided_slice %18 {offsets = [0, 0], sizes = [32, 1], strides = [1, 1]} : vector<32x2xf32> to vector<32x1xf32>
    %21 = vector.broadcast %20 : vector<32x1xf32> to vector<32x16xf32>
    %22 = arith.mulf %21, %17 : vector<32x16xf32>
    %cst_9 = arith.constant dense<0.000000e+00> : vector<16xf32>
    %23 = vector.multi_reduction <add>, %22, %cst_9 [0] : vector<32x16xf32> to vector<16xf32>
    %24 = vector.shape_cast %23 : vector<16xf32> to vector<1x16xf32>
    %25 = vector.extract_strided_slice %19 {offsets = [0, 0], sizes = [1, 1], strides = [1, 1]} : vector<2x1xf32> to vector<1x1xf32>
    %26 = vector.broadcast %25 : vector<1x1xf32> to vector<1x16xf32>
    %27 = arith.addf %24, %26 : vector<1x16xf32>
    %c0_10 = arith.constant 0 : index
    %c0_11 = arith.constant 0 : index
    %28 = vector.load %arg6[%c0_10, %c0_11] : memref<2x16xf32, #tpu.memory_space<vmem>>, vector<1x16xf32>
    tpu.vector_store %arg6[%c0_10, %c0_11], %27 {strides = array<i32>} : memref<2x16xf32, #tpu.memory_space<vmem>>, vector<1x16xf32>,
    %29 = vector.extract_strided_slice %18 {offsets = [0, 1], sizes = [32, 1], strides = [1, 1]} : vector<32x2xf32> to vector<32x1xf32>
    %30 = vector.broadcast %29 : vector<32x1xf32> to vector<32x16xf32>
    %31 = arith.mulf %30, %17 : vector<32x16xf32>
    %cst_12 = arith.constant dense<0.000000e+00> : vector<16xf32>
    %32 = vector.multi_reduction <add>, %31, %cst_12 [0] : vector<32x16xf32> to vector<16xf32>
    %33 = vector.shape_cast %32 : vector<16xf32> to vector<1x16xf32>
    %34 = vector.extract_strided_slice %19 {offsets = [1, 0], sizes = [1, 1], strides = [1, 1]} : vector<2x1xf32> to vector<1x1xf32>
    %35 = vector.broadcast %34 : vector<1x1xf32> to vector<1x16xf32>
    %36 = arith.addf %33, %35 : vector<1x16xf32>
    %c1 = arith.constant 1 : index
    %c0_13 = arith.constant 0 : index
    %37 = vector.load %arg6[%c1, %c0_13] : memref<2x16xf32, #tpu.memory_space<vmem>>, vector<1x16xf32>
    tpu.vector_store %arg6[%c1, %c0_13], %36 {strides = array<i32>} : memref<2x16xf32, #tpu.memory_space<vmem>>, vector<1x16xf32>,
    return
  }
  func.func @transform_0(%arg0: i32) -> (i32, i32) {
    %c0_i32 = arith.constant 0 : i32
    %c0_i32_0 = arith.constant 0 : i32
    return %c0_i32, %arg0 : i32, i32
  }
  func.func @transform_1(%arg0: i32) -> (i32, i32) {
    %c0_i32 = arith.constant 0 : i32
    %c0_i32_0 = arith.constant 0 : i32
    %c0_i32_1 = arith.constant 0 : i32
    return %c0_i32, %c0_i32_0 : i32, i32
  }
  func.func @transform_2(%arg0: i32) -> (i32, i32) {
    %c0_i32 = arith.constant 0 : i32
    %c0_i32_0 = arith.constant 0 : i32
    %c0_i32_1 = arith.constant 0 : i32
    return %c0_i32, %c0_i32_0 : i32, i32
  }
  func.func @transform_3(%arg0: i32) -> (i32, i32) {
    %c0_i32 = arith.constant 0 : i32
    %c0_i32_0 = arith.constant 0 : i32
    %c0_i32_1 = arith.constant 0 : i32
    return %c0_i32, %c0_i32_0 : i32, i32
  }
  func.func @transform_4(%arg0: i32) -> (i32, i32) {
    %c0_i32 = arith.constant 0 : i32
    %c0_i32_0 = arith.constant 0 : i32
    %c0_i32_1 = arith.constant 0 : i32
    return %c0_i32, %c0_i32_0 : i32, i32
  }
  func.func @transform_5(%arg0: i32) -> (i32, i32) {
    %c0_i32 = arith.constant 0 : i32
    %c0_i32_0 = arith.constant 0 : i32
    return %c0_i32, %arg0 : i32, i32
  }
}

</mosaic_0001>

<bundles_post_ra>
// kernel: tpu_custom_call.1
= control target key start
LH: loop header
LB: loop body
LE: loop exit
PB: predicated region body
PF: predicated region fallthrough
CT: control target
= control target key end

     0   :  { %v248_v1 = vmov 1   ;;  %v249_v2 = vmov 0   ;;  %s343_s0 = inlined_call_operand.vmem [shape: f32[2,16], index: 0, kind: input, shape index: {}]   ;;  %s344_s1 = inlined_call_operand.vmem [shape: f32[32,2], index: 1, kind: input, shape index: {}]   ;;  %s345_s2 = inlined_call_operand.vmem [shape: f32[32,1], index: 2, kind: input, shape index: {}]   ;;  %s346_s3 = inlined_call_operand.vmem [shape: f32[32,2], index: 3, kind: input, shape index: {}]   ;;  %s347_s4 = inlined_call_operand.vmem [shape: f32[2,1], index: 4, kind: input, shape index: {}]   ;;  %s348_s5 = inlined_call_operand.hbm [shape: f32[2,16], index: 5, kind: output, shape index: {}]  }
   0x1   :  { %v22_v0 = vld [vmem:[%s344_s1] sm:$0xff]  ;;  %219 = vset.pattern.permute.xlu1 %v248_v1  ;;  %218 = vset.pattern.permute.xlu0 %v249_v2  ;;  %v23_v3 = vld [vmem:[%s344_s1 + $0x8] sm:$0xff] }
   0x2   :  { %59 = vperm.xlu1 %219, %v22_v0   ;;  %32 = vperm.xlu0 %218, %v22_v0  }
   0x3   :  { %10 = vsyncpa [#allocation3], 0  ;;  %v24_v4 = vld [vmem:[%s344_s1 + $0x10] sm:$0xff]  ;;  %v25_v5 = vld [vmem:[%s344_s1 + $0x18] sm:$0xff]  ;;  %v50_v17 = vlaneseq  ;;  %vm143_vm0 = vcmask 130048   ;;  %vm199_vm1 = vcmask 123905  }
   0x4   :  { %v26_v6 = vld [vmem:[%s345_s2] sm:$0xff]  ;;  %v27_v7 = vld [vmem:[%s345_s2 + $0x8] sm:$0xff]  ;;  %v28_v8 = vld [vmem:[%s345_s2 + $0x10] sm:$0xff]  ;;  %vm163_vm2 = vcmask 122880  }
   0x5   :  { %v29_v9 = vld [vmem:[%s345_s2 + $0x18] sm:$0xff]  ;;  %v114_v10 = vld [vmem:[%s346_s3] sm:$0xff]  ;;  %v115_v11 = vld [vmem:[%s346_s3 + $0x8] sm:$0xff]  ;;  %v51_v20 = vshrl.u32 %v50_v17, 7 }
   0x6   :  { %63 = vperm.xlu1 %219, %v23_v3   ;;  %37 = vperm.xlu0 %218, %v23_v3   ;;  %v116_v12 = vld [vmem:[%s346_s3 + $0x10] sm:$0xff]  ;;  %v117_v13 = vld [vmem:[%s346_s3 + $0x18] sm:$0xff]  ;;  %v118_v14 = vld [vmem:[%s347_s4] sm:$0x3] }
   0x7   :  { %v76_v23 = vsub.s32 1, %v51_v20  ;;  %v52_v24 = vsub.s32 0, %v51_v20  ;;  %v21_v25 = vld [vmem:[%s343_s0] sm:$0x3]  ;;  %s250_s0 = smov [#allocation2]  }
   0x8   :  { %s207_s4 = sshll.u32 %s250_s0, 4  ;;  %s208_s4 = int_to_ptr.vmem [resolvable:$true] %s207_s4 }
   0x9   :  { %v77_v28 = vrot.slane %v21_v25, %v76_v23  ;;  %v53_v29 = vrot.slane %v21_v25, %v52_v24  ;;  %s224_s18 = scalar_lea.vmem %s208_s4, 32  ;;  %p229_p1 = scmp.lt.s32.totalorder %s208_s4, %s208_s4 }
   0xa   :  { %67 = vperm.xlu1 %219, %v24_v4   ;;  %42 = vperm.xlu0 %218, %v24_v4   ;;  %p225_p0 = scmp.ne.s32.totalorder %s208_s4, %s224_s18  ;;  %p230_p2 = scmp.lt.s32.totalorder %s224_s18, %s224_s18 }
   0xc   :  { %p231_p3 = por %p230_p2, %p229_p1 }
   0xe   :  { %71 = vperm.xlu1 %219, %v25_v5   ;;  %47 = vperm.xlu0 %218, %v25_v5   ;;  %p232_p4 = pnand %p231_p3, %p225_p0 }
  0x12   :  { %220 = vset.pattern.permute.xlu1 %v249_v2  ;;  %88 = vperm.xlu0 %218, %v26_v6  }
  0x13   :  { %93 = vperm.xlu1 %220, %v27_v7  }
  0x16   :  { %98 = vperm.xlu0 %218, %v28_v8  }
  0x17   :  { %103 = vperm.xlu1 %220, %v29_v9  }
  0x1a   :  { %121 = vperm.xlu0 %218, %v114_v10  }
  0x1b   :  { %126 = vperm.xlu1 %220, %v115_v11  }
  0x1e   :  { %221 = vset.pattern.permute.xlu0 %v248_v1 }
  0x1f   :  { %222 = vset.pattern.permute.xlu1 %v248_v1  ;;  %166 = vperm.xlu0 %221, %v114_v10  }
  0x20   :  { %170 = vperm.xlu1 %222, %v115_v11  }
  0x23   :  { %174 = vperm.xlu0 %221, %v116_v12  }
  0x24   :  { %223 = vset.pattern.permute.xlu1 %v249_v2 }
  0x25   :  { %131 = vperm.xlu1 %223, %v116_v12  }
  0x27   :  { %178 = vperm.xlu0 %221, %v117_v13  }
  0x29   :  { %136 = vperm.xlu1 %223, %v117_v13  }
  0x2d   :  { %159 = vperm.xlu1 %223, %v118_v14  }
  0x81   :  { %v60_v15 = vpop.permute.xlu1 %59  ;;  %v33_v16 = vpop.permute.xlu0 %32 }
  0x82   :  { %v78_v32 = vmul.f32 %v77_v28, %v60_v15  ;;  %v54_v33 = vmul.f32 %v53_v29, %v33_v16 }
  0x84   :  { %v82_v40 = vadd.f32 %v78_v32, %v54_v33 }
  0x85   :  { %v64_v18 = vpop.permute.xlu1 %63  ;;  %v38_v19 = vpop.permute.xlu0 %37 }
  0x86   :  { %v79_v34 = vmul.f32 %v77_v28, %v64_v18  ;;  %v55_v35 = vmul.f32 %v53_v29, %v38_v19 }
  0x88   :  { %v83_v41 = vadd.f32 %v79_v34, %v55_v35 }
  0x89   :  { %v68_v21 = vpop.permute.xlu1 %67  ;;  %v43_v22 = vpop.permute.xlu0 %42 }
  0x8a   :  { %v80_v38 = vmul.f32 %v77_v28, %v68_v21  ;;  %v56_v39 = vmul.f32 %v53_v29, %v43_v22 }
  0x8c   :  { %v84_v48 = vadd.f32 %v80_v38, %v56_v39 }
  0x8d   :  { %v72_v26 = vpop.permute.xlu1 %71  ;;  %v48_v27 = vpop.permute.xlu0 %47 }
  0x8e   :  { %v81_v44 = vmul.f32 %v77_v28, %v72_v26  ;;  %v57_v45 = vmul.f32 %v53_v29, %v48_v27 }
  0x90   :  { %v85_v52 = vadd.f32 %v81_v44, %v57_v45 }
  0x91   :  { %v89_v30 = vpop.permute.xlu0 %88 }
  0x92   :  { %v94_v31 = vpop.permute.xlu1 %93  ;;  %v106_v42 = vadd.f32 %v89_v30, %v82_v40 }
  0x93   :  { %v107_v46 = vadd.f32 %v94_v31, %v83_v41 }
  0x94   :  { %v110_v49 = vmax.f32 %v106_v42, 0.0 }
  0x95   :  { %v99_v36 = vpop.permute.xlu0 %98  ;;  %v111_v51 = vmax.f32 %v107_v46, 0.0 }
  0x96   :  { %v104_v37 = vpop.permute.xlu1 %103  ;;  %v108_v50 = vadd.f32 %v99_v36, %v84_v48 }
  0x97   :  { %v109_v56 = vadd.f32 %v104_v37, %v85_v52 }
  0x98   :  { %v112_v58 = vmax.f32 %v108_v50, 0.0 }
  0x99   :  { %v122_v43 = vpop.permute.xlu0 %121  ;;  %v113_v1 = vmax.f32 %v109_v56, 0.0 }
  0x9a   :  { %v127_v47 = vpop.permute.xlu1 %126  ;;  %v139_v59 = vmul.f32 %v122_v43, %v110_v49 }
  0x9b   :  { %v140_v60 = vmul.f32 %v127_v47, %v111_v51 }
  0x9c   :  { %v144_v4 = vsel %vm143_vm0, %v139_v59, 0.0 }
  0x9d   :  { %v145_v5 = vsel %vm143_vm0, %v140_v60, 0.0 }
  0x9e   :  { %v167_v53 = vpop.permute.xlu0 %166  ;;  %v146_v11 = vadd.f32 %v145_v5, %v144_v4 }
  0x9f   :  { %v181_v54 = vmul.f32 %v167_v53, %v110_v49  ;;  %v171_v55 = vpop.permute.xlu1 %170 }
  0xa0   :  { %v182_v57 = vmul.f32 %v171_v55, %v111_v51 }
  0xa1   :  { %v185_v61 = vsel %vm143_vm0, %v181_v54, 0.0 }
  0xa2   :  { %v186_v62 = vsel %vm143_vm0, %v182_v57, 0.0  ;;  %v175_v63 = vpop.permute.xlu0 %174 }
  0xa3   :  { %v183_v0 = vmul.f32 %v175_v63, %v112_v58  ;;  %v187_v2 = vadd.f32 %v186_v62, %v185_v61 }
  0xa4   :  { %v132_v3 = vpop.permute.xlu1 %131 }
  0xa5   :  { %v188_v6 = vsel %vm143_vm0, %v183_v0, 0.0  ;;  %v141_v7 = vmul.f32 %v132_v3, %v112_v58 }
  0xa6   :  { %v179_v8 = vpop.permute.xlu0 %178  ;;  %v189_v12 = vadd.f32 %v188_v6, %v187_v2 }
  0xa7   :  { %v147_v9 = vsel %vm143_vm0, %v141_v7, 0.0  ;;  %v184_v10 = vmul.f32 %v179_v8, %v113_v1 }
  0xa8   :  { %v137_v13 = vpop.permute.xlu1 %136  ;;  %v148_v16 = vadd.f32 %v147_v9, %v146_v11 }
  0xa9   :  { %v190_v14 = vsel %vm143_vm0, %v184_v10, 0.0  ;;  %v142_v15 = vmul.f32 %v137_v13, %v113_v1 }
  0xaa   :  { %v191_v17 = vadd.f32 %v190_v14, %v189_v12 }
  0xab   :  { %v149_v18 = vsel %vm143_vm0, %v142_v15, 0.0 }
  0xac   :  { %v192_v19 = vrot.slane %v191_v17, 4  ;;  %v150_v20 = vadd.f32 %v149_v18, %v148_v16  ;;  %v160_v31 = vpop.permute.xlu1 %159 }
  0xae   :  { %v193_v21 = vadd.f32 %v192_v19, %v191_v17  ;;  %v151_v22 = vrot.slane %v150_v20, 4 }
  0xb0   :  { %v152_v23 = vadd.f32 %v151_v22, %v150_v20  ;;  %v194_v24 = vrot.slane %v193_v21, 2 }
  0xb2   :  { %v153_v25 = vrot.slane %v152_v23, 2  ;;  %v195_v26 = vadd.f32 %v194_v24, %v193_v21 }
  0xb4   :  { %v154_v27 = vadd.f32 %v153_v25, %v152_v23  ;;  %v196_v28 = vrot.slane %v195_v26, 1 }
  0xb6   :  { %v155_v29 = vrot.slane %v154_v27, 1  ;;  %v197_v30 = vadd.f32 %v196_v28, %v195_v26 }
  0xb8   :  { %v156_v32 = vadd.f32 %v155_v29, %v154_v27  ;;  %v198_v33 = vadd.f32 %v197_v30, %v160_v31 }
  0xba   :  { %v162_v34 = vadd.f32 %v160_v31, %v156_v32  ;;  %200 = vst.msk [vmem:[#allocation2] sm:$0x2] %vm199_vm1, %v198_v33 }
  0xbc   :  { %164 = vst.msk [vmem:[#allocation2] sm:$0x1] %vm163_vm2, %v162_v34 }
  0xbd   :  { %235 = shalt.err (!%p232_p4)
}
  0xbe   :  { %s236_s21 = scalar_lea.hbm %s348_s5, 32 }
  0xbf   :  { %p237_p5 = scmp.ne.s32.totalorder %s348_s5, %s236_s21  ;;  %p240_p6 = scmp.lt.u32.totalorder %s236_s21, %s348_s5 }
  0xc1   :  { %p242_p7 = pnand %p240_p6, %p237_p5 }
  0xc3   :  { %245 = shalt.err (!%p242_p7)
}
  0xc4   :  { %210 = dma.vmem_to_hbm [thread:$0]  %s208_s4, 32, %s348_s5, [#allocation3]  }
  0xc5   :  { %246 = dma.done.wait [#allocation3], 32  }
  0xc6   :  { %247 = vsyncadd [#allocation3], 4294967264 }
  0xc7   :  { %214 = vsyncpa [#allocation3], 1 }

</bundles_post_ra>
